<compile_context>
chip_gen: v5e
topology: v5e:2x2
jax: 0.10.0
libtpu: 0.0.40
codegen_flags: <defaults>
</compile_context>

<pallas_src>
import math
from functools import partial

import jax
import jax.numpy as jnp
from jax.experimental import pallas as pl
from jax.experimental.pallas import tpu as pltpu


def _match_embedding_kernel(s1_ref, s2_ref, info_ref, a1_ref, a2_ref, w3_ref,
                            b_ref, o_ref):
    # y = s1 @ A1 + s2 @ A2 + info @ W3 + b'   (f32 accumulate on the MXU,
    # bias add in f32 on the VPU; operands may be bf16).
    y = (jnp.dot(s1_ref[...], a1_ref[...], preferred_element_type=jnp.float32)
         + jnp.dot(s2_ref[...], a2_ref[...], preferred_element_type=jnp.float32)
         + jnp.dot(info_ref[...], w3_ref[...],
                   preferred_element_type=jnp.float32)
         + b_ref[...])
    o_ref[...] = y.astype(o_ref.dtype)          # lane-dense (tm, O_pad) store


def prepare_params(params, n1, n2, *, use_bf16=False):
    """One-time parameter glue (do NOT run per call).

    params = (w_player, b_player, w_proj, b_proj) in torch Linear layout:
      w_player: (E, F), b_player: (E,), w_proj: (O, 2E+Di), b_proj: (O,).

    Returns folded weights (A1, A2, W3, b_fold) with projection columns
    zero-padded to a multiple of 128 lanes.
    """
    w_p, b_p, w_o, b_o = params
    E, F = w_p.shape
    O, in_ch = w_o.shape
    assert in_ch >= 2 * E, "proj in_channels must be >= 2 * embed_dim"
    O_pad = pl.cdiv(O, 128) * 128

    wp_t = w_p.T                                   # (F, E)
    w_o_t = w_o.T                                  # (2E+Di, O)
    w1 = w_o_t[:E, :]                              # (E, O)   acts on e1
    w2 = w_o_t[E:2 * E, :]                         # (E, O)   acts on e2
    w3 = w_o_t[2 * E:, :]                          # (Di, O)  acts on info

    # Fold the (Linear) player module into the projection.
    a1 = wp_t @ w1                                 # (F, O)
    a2 = wp_t @ w2                                 # (F, O)
    b_fold = n1 * (b_p @ w1) + n2 * (b_p @ w2) + b_o   # (O,)

    pad = ((0, 0), (0, O_pad - O))
    a1 = jnp.pad(a1, pad)
    a2 = jnp.pad(a2, pad)
    w3 = jnp.pad(w3, pad)
    b_fold = jnp.pad(b_fold, (0, O_pad - O)).reshape(1, O_pad)

    mm_dtype = jnp.bfloat16 if use_bf16 else jnp.float32
    return (a1.astype(mm_dtype), a2.astype(mm_dtype), w3.astype(mm_dtype),
            b_fold.astype(jnp.float32))


@partial(jax.jit, static_argnames=("out_channels",))
def match_embedding(team1, team2, info, weights, *, out_channels):
    """Forward pass. `weights` comes from prepare_params (computed once)."""
    a1, a2, w3, b_fold = weights
    B, T, n1, F = team1.shape
    Di = info.shape[-1]
    O_pad = a1.shape[1]
    BT = B * T
    mm_dtype = a1.dtype

    # Pre-sum each team over the player axis (linearity of the player Linear),
    # then flatten (B, T) -> rows.
    s1 = jnp.sum(team1, axis=2).reshape(BT, F).astype(mm_dtype)
    s2 = jnp.sum(team2, axis=2).reshape(BT, F).astype(mm_dtype)
    info2 = info.reshape(BT, Di).astype(mm_dtype)

    # Row tile: sublane-aligned (multiple of 8); single tile for small BT,
    # 512-row tiles (pipelined, megacore-parallel) when BT grows.
    if BT <= 1024:
        tm = pl.cdiv(BT, 8) * 8
    else:
        tm = 512
    BT_pad = pl.cdiv(BT, tm) * tm
    if BT_pad != BT:
        rp = ((0, BT_pad - BT), (0, 0))
        s1 = jnp.pad(s1, rp)
        s2 = jnp.pad(s2, rp)
        info2 = jnp.pad(info2, rp)

    row = lambda i: (i, 0)      # tiled along rows
    rep = lambda i: (0, 0)      # replicated (weights / bias)

    out = pl.pallas_call(
        _match_embedding_kernel,
        out_shape=jax.ShapeDtypeStruct((BT_pad, O_pad), jnp.float32),
        grid_spec=pltpu.PrefetchScalarGridSpec(
            num_scalar_prefetch=0,
            grid=(BT_pad // tm,),
            in_specs=[
                pl.BlockSpec((tm, F), row),        # s1
                pl.BlockSpec((tm, F), row),        # s2
                pl.BlockSpec((tm, Di), row),       # info
                pl.BlockSpec((F, O_pad), rep),     # A1
                pl.BlockSpec((F, O_pad), rep),     # A2
                pl.BlockSpec((Di, O_pad), rep),    # W3
                pl.BlockSpec((1, O_pad), rep),     # b'
            ],
            out_specs=pl.BlockSpec((tm, O_pad), row),
        ),
        compiler_params=pltpu.CompilerParams(
            dimension_semantics=("parallel",)),
    )(s1, s2, info2, a1, a2, w3, b_fold)

    return out[:BT, :out_channels].reshape(B, T, out_channels)


def reference(team1, team2, info, params):
    """Plain-JAX mirror of the PyTorch forward (player module = Linear)."""
    w_p, b_p, w_o, b_o = params
    B, T, n1, F = team1.shape
    n2 = team2.shape[2]
    e1 = (team1.reshape(B * T, n1, F) @ w_p.T + b_p).sum(axis=1).reshape(B, T, -1)
    e2 = (team2.reshape(B * T, n2, F) @ w_p.T + b_p).sum(axis=1).reshape(B, T, -1)
    fused = jnp.concatenate([e1, e2, info], axis=-1)
    return fused @ w_o.T + b_o


if __name__ == "__main__":
    B, T, n1, n2 = 2, 4, 5, 4
    F, E, Di, O = 8, 16, 6, 32
    in_channels = 2 * E + Di

    key = jax.random.PRNGKey(0)
    ks = jax.random.split(key, 7)
    team1 = jax.random.normal(ks[0], (B, T, n1, F), jnp.float32)
    team2 = jax.random.normal(ks[1], (B, T, n2, F), jnp.float32)
    info = jax.random.normal(ks[2], (B, T, Di), jnp.float32)

    bnd_p = 1.0 / math.sqrt(F)
    w_p = jax.random.uniform(ks[3], (E, F), jnp.float32, -bnd_p, bnd_p)
    b_p = jax.random.uniform(ks[4], (E,), jnp.float32, -bnd_p, bnd_p)
    bnd_o = 1.0 / math.sqrt(in_channels)
    w_o = jax.random.uniform(ks[5], (O, in_channels), jnp.float32, -bnd_o, bnd_o)
    b_o = jax.random.uniform(ks[6], (O,), jnp.float32, -bnd_o, bnd_o)
    params = (w_p, b_p, w_o, b_o)

    y_ref = reference(team1, team2, info, params)

    # f32 MXU-operand path: exact (up to associativity) vs. the reference.
    weights_f32 = prepare_params(params, n1, n2, use_bf16=False)
    y = match_embedding(team1, team2, info, weights_f32, out_channels=O)
    y = jax.block_until_ready(y)
    err = float(jnp.max(jnp.abs(y - y_ref)))
    assert jnp.allclose(y, y_ref, atol=1e-4, rtol=1e-4), f"max abs err {err}"

    # bf16 MXU-operand path (v6e/v7x feedback): looser tolerance.
    weights_bf16 = prepare_params(params, n1, n2, use_bf16=True)
    y_bf = match_embedding(team1, team2, info, weights_bf16, out_channels=O)
    y_bf = jax.block_until_ready(y_bf)
    err_bf = float(jnp.max(jnp.abs(y_bf - y_ref)))
    assert jnp.allclose(y_bf, y_ref, atol=5e-2, rtol=5e-2), f"bf16 err {err_bf}"

    print("KERNEL_OK")
</pallas_src>

<mosaic_0001>
module attributes {stable_mosaic.version = 11 : i64} {
  func.func @_match_embedding_kernel(%arg0: i32, %arg1: memref<8x8xf32, #tpu.memory_space<vmem>>, %arg2: memref<8x8xf32, #tpu.memory_space<vmem>>, %arg3: memref<8x6xf32, #tpu.memory_space<vmem>>, %arg4: memref<8x128xf32, #tpu.memory_space<vmem>>, %arg5: memref<8x128xf32, #tpu.memory_space<vmem>>, %arg6: memref<6x128xf32, #tpu.memory_space<vmem>>, %arg7: memref<1x128xf32, #tpu.memory_space<vmem>>, %arg8: memref<8x128xf32, #tpu.memory_space<vmem>>) attributes {dimension_semantics = [#tpu.dimension_semantics<parallel>], iteration_bounds = array<i64: 1>, scalar_prefetch = 0 : i64, scratch_operands = 0 : i64, tpu.core_type = #tpu.core_type<tc>, window_params = [{transform_indices = @transform_0, window_bounds = array<i64: 8, 8>}, {transform_indices = @transform_1, window_bounds = array<i64: 8, 8>}, {transform_indices = @transform_2, window_bounds = array<i64: 8, 6>}, {pipeline_mode = #tpu.pipeline_mode<synchronous>, transform_indices = @transform_3, window_bounds = array<i64: 8, 128>}, {pipeline_mode = #tpu.pipeline_mode<synchronous>, transform_indices = @transform_4, window_bounds = array<i64: 8, 128>}, {pipeline_mode = #tpu.pipeline_mode<synchronous>, transform_indices = @transform_5, window_bounds = array<i64: 6, 128>}, {pipeline_mode = #tpu.pipeline_mode<synchronous>, transform_indices = @transform_6, window_bounds = array<i64: 1, 128>}, {transform_indices = @transform_7, window_bounds = array<i64: 8, 128>}]} {
    %c0 = arith.constant 0 : index
    %c0_0 = arith.constant 0 : index
    %0 = vector.load %arg1[%c0, %c0_0] : memref<8x8xf32, #tpu.memory_space<vmem>>, vector<8x8xf32>
    %c0_1 = arith.constant 0 : index
    %c0_2 = arith.constant 0 : index
    %1 = vector.load %arg4[%c0_1, %c0_2] : memref<8x128xf32, #tpu.memory_space<vmem>>, vector<8x128xf32>
    %cst = arith.constant dense<0.000000e+00> : vector<8x128xf32>
    %2 = tpu.matmul %0, %1, %cst {dimension_numbers = #tpu.dot_dimension_numbers<[1], [0], [0], [1], [0, 0, 1, 1], [], []>} : vector<8x8xf32>, vector<8x128xf32>, vector<8x128xf32> -> vector<8x128xf32>
    %c0_3 = arith.constant 0 : index
    %c0_4 = arith.constant 0 : index
    %3 = vector.load %arg2[%c0_3, %c0_4] : memref<8x8xf32, #tpu.memory_space<vmem>>, vector<8x8xf32>
    %c0_5 = arith.constant 0 : index
    %c0_6 = arith.constant 0 : index
    %4 = vector.load %arg5[%c0_5, %c0_6] : memref<8x128xf32, #tpu.memory_space<vmem>>, vector<8x128xf32>
    %cst_7 = arith.constant dense<0.000000e+00> : vector<8x128xf32>
    %5 = tpu.matmul %3, %4, %cst_7 {dimension_numbers = #tpu.dot_dimension_numbers<[1], [0], [0], [1], [0, 0, 1, 1], [], []>} : vector<8x8xf32>, vector<8x128xf32>, vector<8x128xf32> -> vector<8x128xf32>
    %6 = arith.addf %2, %5 : vector<8x128xf32>
    %c0_8 = arith.constant 0 : index
    %c0_9 = arith.constant 0 : index
    %7 = vector.load %arg3[%c0_8, %c0_9] : memref<8x6xf32, #tpu.memory_space<vmem>>, vector<8x6xf32>
    %c0_10 = arith.constant 0 : index
    %c0_11 = arith.constant 0 : index
    %8 = vector.load %arg6[%c0_10, %c0_11] : memref<6x128xf32, #tpu.memory_space<vmem>>, vector<6x128xf32>
    %cst_12 = arith.constant dense<0.000000e+00> : vector<8x128xf32>
    %9 = tpu.matmul %7, %8, %cst_12 {dimension_numbers = #tpu.dot_dimension_numbers<[1], [0], [0], [1], [0, 0, 1, 1], [], []>} : vector<8x6xf32>, vector<6x128xf32>, vector<8x128xf32> -> vector<8x128xf32>
    %10 = arith.addf %6, %9 : vector<8x128xf32>
    %c0_13 = arith.constant 0 : index
    %c0_14 = arith.constant 0 : index
    %11 = vector.load %arg7[%c0_13, %c0_14] : memref<1x128xf32, #tpu.memory_space<vmem>>, vector<1x128xf32>
    %12 = vector.broadcast %11 : vector<1x128xf32> to vector<8x128xf32>
    %13 = arith.addf %10, %12 : vector<8x128xf32>
    %c0_15 = arith.constant 0 : index
    %c0_16 = arith.constant 0 : index
    %14 = vector.load %arg8[%c0_15, %c0_16] : memref<8x128xf32, #tpu.memory_space<vmem>>, vector<8x128xf32>
    tpu.vector_store %arg8[%c0_15, %c0_16], %13 {strides = array<i32>} : memref<8x128xf32, #tpu.memory_space<vmem>>, vector<8x128xf32>,
    return
  }
  func.func @transform_0(%arg0: i32) -> (i32, i32) {
    %c0_i32 = arith.constant 0 : i32
    %c0_i32_0 = arith.constant 0 : i32
    return %arg0, %c0_i32 : i32, i32
  }
  func.func @transform_1(%arg0: i32) -> (i32, i32) {
    %c0_i32 = arith.constant 0 : i32
    %c0_i32_0 = arith.constant 0 : i32
    return %arg0, %c0_i32 : i32, i32
  }
  func.func @transform_2(%arg0: i32) -> (i32, i32) {
    %c0_i32 = arith.constant 0 : i32
    %c0_i32_0 = arith.constant 0 : i32
    return %arg0, %c0_i32 : i32, i32
  }
  func.func @transform_3(%arg0: i32) -> (i32, i32) {
    %c0_i32 = arith.constant 0 : i32
    %c0_i32_0 = arith.constant 0 : i32
    %c0_i32_1 = arith.constant 0 : i32
    return %c0_i32, %c0_i32_0 : i32, i32
  }
  func.func @transform_4(%arg0: i32) -> (i32, i32) {
    %c0_i32 = arith.constant 0 : i32
    %c0_i32_0 = arith.constant 0 : i32
    %c0_i32_1 = arith.constant 0 : i32
    return %c0_i32, %c0_i32_0 : i32, i32
  }
  func.func @transform_5(%arg0: i32) -> (i32, i32) {
    %c0_i32 = arith.constant 0 : i32
    %c0_i32_0 = arith.constant 0 : i32
    %c0_i32_1 = arith.constant 0 : i32
    return %c0_i32, %c0_i32_0 : i32, i32
  }
  func.func @transform_6(%arg0: i32) -> (i32, i32) {
    %c0_i32 = arith.constant 0 : i32
    %c0_i32_0 = arith.constant 0 : i32
    %c0_i32_1 = arith.constant 0 : i32
    return %c0_i32, %c0_i32_0 : i32, i32
  }
  func.func @transform_7(%arg0: i32) -> (i32, i32) {
    %c0_i32 = arith.constant 0 : i32
    %c0_i32_0 = arith.constant 0 : i32
    return %arg0, %c0_i32 : i32, i32
  }
}

</mosaic_0001>

<bundles_post_ra>
// kernel: match_embedding.1
= control target key start
LH: loop header
LB: loop body
LE: loop exit
PB: predicated region body
PF: predicated region fallthrough
CT: control target
= control target key end

     0   :  { %vm84_vm0 = vcmask 1045504   ;;  %vm80_vm1 = vcmask 48128   ;;  %vm31_vm2 = vcmask 64512   ;;  %s228_s0 = inlined_call_operand.vmem [shape: f32[8,8], index: 0, kind: input, shape index: {}]   ;;  %s229_s1 = inlined_call_operand.vmem [shape: f32[8,8], index: 1, kind: input, shape index: {}]   ;;  %s230_s2 = inlined_call_operand.vmem [shape: f32[8,6], index: 2, kind: input, shape index: {}]   ;;  %s231_s3 = inlined_call_operand.vmem [shape: f32[8,128], index: 3, kind: input, shape index: {}]   ;;  %s232_s4 = inlined_call_operand.vmem [shape: f32[8,128], index: 4, kind: input, shape index: {}]   ;;  %s233_s5 = inlined_call_operand.vmem [shape: f32[6,128], index: 5, kind: input, shape index: {}]   ;;  %s234_s6 = inlined_call_operand.vmem [shape: f32[1,128], index: 6, kind: input, shape index: {}]   ;;  %s235_s7 = inlined_call_operand.hbm [shape: f32[8,128], index: 7, kind: output, shape index: {}]  }
   0x1   :  { %v79_v0 = vld [vmem:[%s233_s5] sm:$0x3f] }
   0x2   :  { %v78_v1 = vld [vmem:[%s230_s2] sm:$0xff]  ;;  %133 = vmatpush.msk.msra.mxu2 %vm84_vm0, %v79_v0 }
   0x3   :  { %v30_v2 = vld [vmem:[%s232_s4] sm:$0xff]  ;;  %134 = vmatmul.msk.f32.vlgmr.msra.gmra.mxu2 %vm80_vm1, %v78_v1 }
   0x4   :  { %50 = vmatpush.msra.mxu0 %v30_v2  ;;  %v28_v3 = vld [vmem:[%s231_s3] sm:$0xff] }
   0x5   :  { %v29_v4 = vld [vmem:[%s229_s1] sm:$0xff]  ;;  %73 = vmatpush.msra.mxu1 %v28_v3 }
   0x6   :  { %v27_v5 = vld [vmem:[%s228_s0] sm:$0xff] }
   0x7   :  { %12 = vsyncpa [#allocation3], 0  ;;  %131 = vmatmul.msk.f32.vlgmr.msra.gmra.mxu0 %vm31_vm2, %v29_v4  ;;  %132 = vmatmul.msk.f32.vlgmr.msra.gmra.mxu1 %vm31_vm2, %v27_v5  ;;  %v136_v9 = vld [vmem:[%s234_s6] ss:$0 sm:$0xff]  ;;  %s163_s3 = smov [#allocation2]   ;;  %s122_s14 = sshll.u32 %s235_s7, 4  ;;  %s123_s14 = int_to_ptr.hbm [resolvable:$true] %s122_s14 }
   0x8   :  { %s120_s1 = sshll.u32 %s163_s3, 4  ;;  %s121_s1 = int_to_ptr.vmem [resolvable:$true] %s120_s1 }
  0x84   :  { %v52_v6 = vpop.f32.mrf.mxu0  ;;  %v75_v7 = vpop.f32.mrf.mxu1 }
  0x85   :  { %v76_v8 = vadd.f32 %v75_v7, %v52_v6 }
  0x86   :  { %v105_v10 = vpop.f32.mrf.mxu2 }
  0x87   :  { %v108_v11 = vadd.f32 %v105_v10, %v76_v8 }
  0x89   :  { %v113_v12 = vadd.f32 %v136_v9, %v108_v11 }
  0x8b   :  { %114 = vst [vmem:[#allocation2] sm:$0xff] %v113_v12 }
  0x8c   :  { %125 = dma.vmem_to_hbm [thread:$0]  %s121_s1, 128, %s123_s14, [#allocation3]  }
  0x8d   :  { %161 = dma.done.wait [#allocation3], 128  }
  0x8e   :  { %162 = vsyncadd [#allocation3], 4294967168 }
  0x8f   :  { %130 = vsyncpa [#allocation3], 1 }

</bundles_post_ra>
